<compile_context>
chip_gen: v5e
topology: v5e:2x2
jax: 0.10.0
libtpu: 0.0.40
codegen_flags: <defaults>
</compile_context>

<pallas_src>
import math
import functools

import jax
import jax.numpy as jnp
from jax.experimental import pallas as pl
from jax.experimental.pallas import tpu as pltpu


# ------------------------------ small helpers -------------------------------

def _round_up(x, m):
    return -(-x // m) * m


def _pick_tile(dim, pref, align):
    """Largest tile <= pref that is a multiple of `align` and divides `dim`;
    falls back to the full dim (always a legal BlockSpec)."""
    if dim <= pref:
        return dim
    t = (pref // align) * align
    while t >= align:
        if dim % t == 0:
            return t
        t -= align
    return dim


def _row_tiling(M, tm_pref):
    """Fixed, pipeline-friendly row tiling: pad M up instead of collapsing tm to M."""
    if M <= tm_pref:
        M_pad = _round_up(M, 8)
        return M_pad, M_pad
    tm = tm_pref
    return _round_up(M, tm), tm


def _default_vmem_limit():
    # ~half of physical VMEM, capped at 64 MiB: 64 MiB on v5e/v6e (128 MiB VMEM),
    # 32 MiB on v7x (64 MiB/TC).  Safe fallback if the query is unavailable.
    try:
        info = pltpu.get_tpu_info()
        phys = getattr(info, "vmem_capacity_bytes", None)
        if phys:
            return min(64 * 1024 * 1024, int(phys) // 2)
    except Exception:
        pass
    return 32 * 1024 * 1024


_VMEM_LIMIT = _default_vmem_limit()


# ----------------------------- Pallas kernels -------------------------------

def _linear_kernel(x_ref, w_ref, *rest, activation, has_bias, fuse_ln, has_res,
                   nk, use_acc, ln_reuse):
    idx = 0
    b_ref = g_ref = beta_ref = r_ref = None
    if has_bias:
        b_ref = rest[idx]; idx += 1
    if fuse_ln:
        g_ref, beta_ref = rest[idx], rest[idx + 1]; idx += 2
    if has_res:
        r_ref = rest[idx]; idx += 1
    o_ref = rest[idx]; idx += 1
    acc_ref = xn_ref = None
    if use_acc:
        acc_ref = rest[idx]; idx += 1
    if ln_reuse:
        xn_ref = rest[idx]; idx += 1

    j = pl.program_id(1)
    k = pl.program_id(2)

    def _ln_x():
        # row-wise LayerNorm (eps=1e-5, PyTorch default) on the full-K tile, f32 math
        xf = x_ref[...].astype(jnp.float32)
        mean = jnp.mean(xf, axis=-1, keepdims=True)
        var = jnp.mean((xf - mean) ** 2, axis=-1, keepdims=True)
        xf = (xf - mean) * jax.lax.rsqrt(var + 1e-5)
        xf = xf * g_ref[...] + beta_ref[...]
        return xf.astype(w_ref.dtype)

    if fuse_ln:
        if ln_reuse:
            # normalize once per row tile (j == 0), reuse for the remaining N tiles
            @pl.when(j == 0)
            def _():
                xn_ref[...] = _ln_x()
            x = xn_ref[...]
        else:
            x = _ln_x()
    else:
        x = x_ref[...]

    contrib = jnp.dot(x, w_ref[...], preferred_element_type=jnp.float32)

    def _writeback(val):
        out = val
        if has_bias:
            out = out + b_ref[...]
        if activation == "gelu":
            # nn.GELU default in PyTorch = exact (erf) GELU
            out = jax.nn.gelu(out, approximate=False)
        if has_res:
            out = out + r_ref[...].astype(jnp.float32)
        o_ref[...] = out.astype(o_ref.dtype)

    if use_acc:
        @pl.when(k == 0)
        def _():
            acc_ref[...] = jnp.zeros_like(acc_ref)
        acc_ref[...] += contrib

        @pl.when(k == nk - 1)
        def _():
            _writeback(acc_ref[...])
    else:
        _writeback(contrib)


def linear(x, w, b=None, *, ln_g=None, ln_b=None, residual=None, activation=None,
           out_dtype=jnp.bfloat16, tm_pref=256, tn_pref=512, tk_pref=512):
    """x:[M,K](bf16) @ w:[K,N](bf16) [+ b] -> [M,N]; optional fused row-LN on x,
    exact GELU, and fused residual add at writeback."""
    M, K = x.shape
    K2, N = w.shape
    assert K == K2
    fuse_ln = ln_g is not None
    has_bias = b is not None
    has_res = residual is not None

    # --- robust row tiling: pad M to a fixed tile (e.g. B*257 -> multiple of 256) ---
    M_pad, tm = _row_tiling(M, tm_pref)
    if M_pad != M:
        x = jnp.pad(x, ((0, M_pad - M), (0, 0)))
        if has_res:
            residual = jnp.pad(residual, ((0, M_pad - M), (0, 0)))

    tn = _pick_tile(N, tn_pref, 128)
    tk = K if fuse_ln else _pick_tile(K, tk_pref, 128)   # LN needs the full row per tile
    nk = K // tk
    nj = N // tn
    use_acc = nk > 1                 # nk == 1 -> no f32 accumulator scratch / phases
    ln_reuse = fuse_ln and nj > 1    # cache normalized x across N tiles
    grid = (M_pad // tm, nj, nk)

    in_specs = [
        pl.BlockSpec((tm, tk), lambda i, j, k: (i, k)),
        pl.BlockSpec((tk, tn), lambda i, j, k: (k, j)),
    ]
    args = [x, w]
    if has_bias:
        in_specs.append(pl.BlockSpec((1, tn), lambda i, j, k: (0, j)))
        args.append(b)                                   # already f32 (1, N)
    if fuse_ln:
        in_specs.append(pl.BlockSpec((1, tk), lambda i, j, k: (0, k)))
        in_specs.append(pl.BlockSpec((1, tk), lambda i, j, k: (0, k)))
        args += [ln_g, ln_b]                             # already f32 (1, K)
    if has_res:
        in_specs.append(pl.BlockSpec((tm, tn), lambda i, j, k: (i, j)))
        args.append(residual)

    scratch = []
    if use_acc:
        scratch.append(pltpu.VMEM((tm, tn), jnp.float32))
    if ln_reuse:
        scratch.append(pltpu.VMEM((tm, K), jnp.bfloat16))

    # keep the N axis sequential when the LN cache is reused across it
    dims = ("parallel", "arbitrary" if ln_reuse else "parallel", "arbitrary")

    kernel = functools.partial(_linear_kernel, activation=activation,
                               has_bias=has_bias, fuse_ln=fuse_ln, has_res=has_res,
                               nk=nk, use_acc=use_acc, ln_reuse=ln_reuse)
    out = pl.pallas_call(
        kernel,
        out_shape=jax.ShapeDtypeStruct((M_pad, N), out_dtype),
        grid=grid,
        in_specs=in_specs,
        out_specs=pl.BlockSpec((tm, tn), lambda i, j, k: (i, j)),
        scratch_shapes=scratch,
        compiler_params=pltpu.CompilerParams(
            dimension_semantics=dims, vmem_limit_bytes=_VMEM_LIMIT),
    )(*args)
    return out if M_pad == M else out[:M]


def _layernorm_kernel(x_ref, g_ref, b_ref, o_ref):
    x = x_ref[...].astype(jnp.float32)
    mean = jnp.mean(x, axis=-1, keepdims=True)
    var = jnp.mean((x - mean) ** 2, axis=-1, keepdims=True)
    y = (x - mean) * jax.lax.rsqrt(var + 1e-5)
    o_ref[...] = (y * g_ref[...] + b_ref[...]).astype(o_ref.dtype)


def layernorm(x, g, b, out_dtype=jnp.bfloat16, tm_pref=256):
    """Standalone row-tiled LayerNorm (only used for ln_pre)."""
    M, D = x.shape
    M_pad, tm = _row_tiling(M, tm_pref)
    if M_pad != M:
        x = jnp.pad(x, ((0, M_pad - M), (0, 0)))
    out = pl.pallas_call(
        _layernorm_kernel,
        out_shape=jax.ShapeDtypeStruct((M_pad, D), out_dtype),
        grid=(M_pad // tm,),
        in_specs=[
            pl.BlockSpec((tm, D), lambda i: (i, 0)),
            pl.BlockSpec((1, D), lambda i: (0, 0)),
            pl.BlockSpec((1, D), lambda i: (0, 0)),
        ],
        out_specs=pl.BlockSpec((tm, D), lambda i: (i, 0)),
        compiler_params=pltpu.CompilerParams(
            dimension_semantics=("parallel",), vmem_limit_bytes=_VMEM_LIMIT),
    )(x, g, b)
    return out if M_pad == M else out[:M]


def _attn_kernel(qkv_ref, o_ref, *, num_heads, hd):
    # one batch element per grid step; all heads processed inside (amortizes the
    # fixed per-grid-step overhead).  The 1/sqrt(hd) scale is folded into the q
    # projection weights, so no rescaling happens here.
    H = num_heads
    x = qkv_ref[0]                                            # (S, 3*H*hd) bf16
    for h in range(H):
        q = x[:, h * hd:(h + 1) * hd]
        k = x[:, (H + h) * hd:(H + h + 1) * hd]
        v = x[:, (2 * H + h) * hd:(2 * H + h + 1) * hd]
        s = jax.lax.dot_general(q, k, (((1,), (1,)), ((), ())),
                                preferred_element_type=jnp.float32)   # (S, S)
        s = s - jnp.max(s, axis=-1, keepdims=True)
        p = jnp.exp(s)
        p = p * pl.reciprocal(jnp.sum(p, axis=-1, keepdims=True), approx=True)
        out_h = jnp.dot(p.astype(v.dtype), v,
                        preferred_element_type=jnp.float32).astype(o_ref.dtype)
        o_ref[0, :, pl.ds(h * hd, hd)] = out_h


def attention(qkv, num_heads, hd):
    """qkv: [B, S, 3*H*hd] (head-major q|k|v packed projection, unpadded) ->
    [B, S, H*hd] bf16."""
    B, S, W3 = qkv.shape
    W = num_heads * hd
    return pl.pallas_call(
        functools.partial(_attn_kernel, num_heads=num_heads, hd=hd),
        out_shape=jax.ShapeDtypeStruct((B, S, W), jnp.bfloat16),
        grid=(B,),
        in_specs=[pl.BlockSpec((1, S, W3), lambda b: (b, 0, 0))],
        out_specs=pl.BlockSpec((1, S, W), lambda b: (b, 0, 0)),
        compiler_params=pltpu.CompilerParams(
            dimension_semantics=("parallel",), vmem_limit_bytes=_VMEM_LIMIT),
    )(qkv)


# ------------------------------- JAX glue -----------------------------------

def extract_patches(img_nchw, patch, feat_pad):
    """[B, C, H, W] -> [B, gh*gw, feat_pad], flatten order (ph, pw, c), zero-padded
    to a lane-aligned feature width."""
    B, C, H, W = img_nchw.shape
    gh, gw = H // patch, W // patch
    x = img_nchw.reshape(B, C, gh, patch, gw, patch)
    x = x.transpose(0, 2, 4, 3, 5, 1)                 # [B, gh, gw, P, P, C]
    x = x.reshape(B, gh * gw, patch * patch * C)
    if feat_pad > patch * patch * C:
        x = jnp.pad(x, ((0, 0), (0, 0), (0, feat_pad - patch * patch * C)))
    return x


def encode_image(image_nchw, params, cfg):
    """OpenCLIP VisionTransformer.forward -> pooled embedding [B, embed_dim] (f16)."""
    P, D, H, hd = cfg["patch"], cfg["width"], cfg["heads"], cfg["head_dim"]
    B = image_nchw.shape[0]

    # MODEL_TO_FLOAT16_ENABLED: image.to(torch.float16); matmuls run bf16 on the MXU.
    x = image_nchw.astype(jnp.float16).astype(jnp.bfloat16)

    # conv1 (stride = kernel = patch, no bias) as a matmul over extracted patches
    patches = extract_patches(x, P, cfg["patch_feat_pad"])            # [B, N, KP]
    Np = patches.shape[1]
    x = linear(patches.reshape(B * Np, cfg["patch_feat_pad"]), params["conv_w"])
    x = x.reshape(B, Np, D)

    # class token + positional embedding
    cls = jnp.broadcast_to(params["class_embedding"][None, None, :], (B, 1, D))
    x = jnp.concatenate([cls, x], axis=1)                             # [B, S, D]
    x = x + params["positional_embedding"][None]
    S = x.shape[1]

    # ln_pre (feeds the residual stream, so it stays standalone)
    x2 = layernorm(x.reshape(B * S, D), params["ln_pre_g"], params["ln_pre_b"])

    # transformer resblocks (encode_image uses all of them)
    for blk in params["blocks"]:
        # attention branch: LN1 fused into the qkv projection (q pre-scaled at init)
        qkv = linear(x2, blk["in_proj_w"], blk["in_proj_b"],
                     ln_g=blk["ln1_g"], ln_b=blk["ln1_b"])            # [B*S, 3*H*hd]
        attn = attention(qkv.reshape(B, S, 3 * H * hd), H, hd)        # [B, S, H*hd]
        # out_proj with fused residual add (x2 + attn_out)
        x2 = linear(attn.reshape(B * S, H * hd),
                    blk["out_proj_w"], blk["out_proj_b"], residual=x2)
        # MLP branch: LN2 fused into fc (+ exact GELU); residual fused into c_proj
        h = linear(x2, blk["fc_w"], blk["fc_b"],
                   ln_g=blk["ln2_g"], ln_b=blk["ln2_b"], activation="gelu")
        x2 = linear(h, blk["cproj_w"], blk["cproj_b"], residual=x2)

    # pool class token; ln_post fused into the (bias-free) visual projection
    pooled = x2.reshape(B, S, D)[:, 0, :]                             # [B, D]
    z = linear(pooled, params["proj"],
               ln_g=params["ln_post_g"], ln_b=params["ln_post_b"],
               out_dtype=jnp.float32)                                 # [B, embed_dim]
    return z.astype(jnp.float16)


# ----------------------------- parameter init -------------------------------

def init_params(key, cfg):
    D, P, L, E, S = cfg["width"], cfg["patch"], cfg["layers"], cfg["embed_dim"], cfg["seq"]
    H, hd = cfg["heads"], cfg["head_dim"]
    KP, Kraw = cfg["patch_feat_pad"], P * P * 3
    keys = iter(jax.random.split(key, 16 + 8 * L))
    nrm = lambda k, shp: 0.02 * jax.random.normal(k, shp, jnp.float32)
    ones_row = jnp.ones((1, D), jnp.float32)
    zeros_row = jnp.zeros((1, D), jnp.float32)

    conv_w_torch = nrm(next(keys), (D, 3, P, P))       # PyTorch conv weight [out, in, kh, kw]
    # permute to (ph, pw, c, out) to match patch flatten order, pad K to lane multiple
    conv_w = conv_w_torch.transpose(2, 3, 1, 0).reshape(Kraw, D)
    if KP > Kraw:
        conv_w = jnp.pad(conv_w, ((0, KP - Kraw), (0, 0)))

    params = {
        "conv_w": conv_w.astype(jnp.bfloat16),
        "class_embedding": nrm(next(keys), (D,)).astype(jnp.bfloat16),
        "positional_embedding": nrm(next(keys), (S, D)).astype(jnp.bfloat16),
        "ln_pre_g": ones_row, "ln_pre_b": zeros_row,
        "ln_post_g": ones_row, "ln_post_b": zeros_row,
        "proj": nrm(next(keys), (D, E)).astype(jnp.bfloat16),
        "blocks": [],
    }

    q_scale = 1.0 / math.sqrt(hd)
    for _ in range(L):
        # stored (in, out); qkv packed col order q|k|v, head-major within each part.
        # TODO(synk): real OpenCLIP checkpoints store (out, in) weights -> transpose at load time.
        in_proj_w = nrm(next(keys), (D, 3 * D))
        in_proj_b = nrm(next(keys), (3 * D,))
        # fold the softmax 1/sqrt(head_dim) into the q projection
        in_proj_w = in_proj_w.at[:, :D].multiply(q_scale)
        in_proj_b = in_proj_b.at[:D].multiply(q_scale)
        params["blocks"].append({
            "ln1_g": ones_row, "ln1_b": zeros_row,
            "in_proj_w": in_proj_w.astype(jnp.bfloat16),
            "in_proj_b": in_proj_b.reshape(1, 3 * D),                 # f32
            "out_proj_w": nrm(next(keys), (D, D)).astype(jnp.bfloat16),
            "out_proj_b": nrm(next(keys), (1, D)),
            "ln2_g": ones_row, "ln2_b": zeros_row,
            "fc_w": nrm(next(keys), (D, 4 * D)).astype(jnp.bfloat16),
            "fc_b": nrm(next(keys), (1, 4 * D)),
            "cproj_w": nrm(next(keys), (4 * D, D)).astype(jnp.bfloat16),
            "cproj_b": nrm(next(keys), (1, D)),
        })
    return params


# ---------------------------------- main -------------------------------------

if __name__ == "__main__":
    # Small synthetic ViT (stands in for ViT-H-14): 32x32 image, patch 16,
    # width 64, 4 heads, 2 resblocks, embed_dim 32.
    cfg = {
        "image_size": 32,
        "patch": 16,
        "width": 64,
        "heads": 4,
        "layers": 2,
        "embed_dim": 32,
    }
    g = cfg["image_size"] // cfg["patch"]
    cfg["seq"] = g * g + 1                                  # +1 class token
    cfg["head_dim"] = cfg["width"] // cfg["heads"]
    cfg["patch_feat_pad"] = _round_up(cfg["patch"] ** 2 * 3, 128)

    key = jax.random.PRNGKey(0)
    k_img, k_par, k_smoke = jax.random.split(key, 3)
    image = jax.random.uniform(k_img, (2, 3, cfg["image_size"], cfg["image_size"]),
                               dtype=jnp.float32)           # NCHW, like PyTorch
    params = init_params(k_par, cfg)

    # Smoke-test the LN-cache (nj > 1) + row-padding linear path that the tiny model
    # config does not reach on its own (the K-split accumulator path is hit by conv1).
    ks = jax.random.split(k_smoke, 2)
    xs = jax.random.normal(ks[0], (20, 64), jnp.float32).astype(jnp.bfloat16)
    ws = jax.random.normal(ks[1], (64, 256), jnp.float32).astype(jnp.bfloat16)
    y = linear(xs, ws, ln_g=jnp.ones((1, 64), jnp.float32),
               ln_b=jnp.zeros((1, 64), jnp.float32), tn_pref=128)
    jax.block_until_ready(y)
    assert y.shape == (20, 256)

    # TODO(synk): pretrained laion2b weights / open_clip preprocess + black_image
    # buffer are checkpoint/PIL plumbing, not part of the compute path.
    z = encode_image(image, params, cfg)
    z = jax.block_until_ready(z)
    assert z.shape == (2, cfg["embed_dim"]) and z.dtype == jnp.float16
    assert bool(jnp.all(jnp.isfinite(z.astype(jnp.float32))))
    print("KERNEL_OK")
</pallas_src>

<mosaic_0001>
module attributes {stable_mosaic.version = 11 : i64} {
  func.func @_linear_kernel(%arg0: i32, %arg1: i32, %arg2: i32, %arg3: memref<24x64xbf16, #tpu.memory_space<vmem>>, %arg4: memref<64x128xbf16, #tpu.memory_space<vmem>>, %arg5: memref<1x64xf32, #tpu.memory_space<vmem>>, %arg6: memref<1x64xf32, #tpu.memory_space<vmem>>, %arg7: memref<24x128xbf16, #tpu.memory_space<vmem>>, %arg8: memref<24x64xbf16, #tpu.memory_space<vmem>>) attributes {dimension_semantics = [#tpu.dimension_semantics<parallel>, #tpu.dimension_semantics<arbitrary>, #tpu.dimension_semantics<arbitrary>], iteration_bounds = array<i64: 1, 2, 1>, scalar_prefetch = 0 : i64, scratch_operands = 1 : i64, tpu.core_type = #tpu.core_type<tc>, window_params = [{transform_indices = @transform_0, window_bounds = array<i64: 24, 64>}, {transform_indices = @transform_1, window_bounds = array<i64: 64, 128>}, {transform_indices = @transform_2, window_bounds = array<i64: 1, 64>}, {transform_indices = @transform_3, window_bounds = array<i64: 1, 64>}, {transform_indices = @transform_4, window_bounds = array<i64: 24, 128>}]} {
    %c0_i32 = arith.constant 0 : i32
    %0 = arith.cmpi eq, %arg1, %c0_i32 : i32
    %1 = arith.extui %0 : i1 to i32
    %c0_i32_0 = arith.constant 0 : i32
    %2 = arith.cmpi ne, %1, %c0_i32_0 : i32
    scf.if %2 {
      %c0_6 = arith.constant 0 : index
      %c0_7 = arith.constant 0 : index
      %8 = vector.load %arg3[%c0_6, %c0_7] : memref<24x64xbf16, #tpu.memory_space<vmem>>, vector<24x64xbf16>
      %9 = arith.extf %8 : vector<24x64xbf16> to vector<24x64xf32>
      %cst_8 = arith.constant dense<0.000000e+00> : vector<24xf32>
      %10 = vector.multi_reduction <add>, %9, %cst_8 [1] : vector<24x64xf32> to vector<24xf32>
      %11 = vector.shape_cast %10 : vector<24xf32> to vector<24x1xf32>
      %cst_9 = arith.constant 6.400000e+01 : f32
      %12 = vector.broadcast %cst_9 : f32 to vector<24x1xf32>
      %13 = arith.divf %11, %12 : vector<24x1xf32>
      %14 = vector.broadcast %13 : vector<24x1xf32> to vector<24x64xf32>
      %15 = arith.subf %9, %14 : vector<24x64xf32>
      %16 = arith.mulf %15, %15 : vector<24x64xf32>
      %cst_10 = arith.constant dense<0.000000e+00> : vector<24xf32>
      %17 = vector.multi_reduction <add>, %16, %cst_10 [1] : vector<24x64xf32> to vector<24xf32>
      %18 = vector.shape_cast %17 : vector<24xf32> to vector<24x1xf32>
      %cst_11 = arith.constant 6.400000e+01 : f32
      %19 = vector.broadcast %cst_11 : f32 to vector<24x1xf32>
      %20 = arith.divf %18, %19 : vector<24x1xf32>
      %21 = vector.broadcast %13 : vector<24x1xf32> to vector<24x64xf32>
      %22 = arith.subf %9, %21 : vector<24x64xf32>
      %cst_12 = arith.constant 9.99999974E-6 : f32
      %23 = vector.broadcast %cst_12 : f32 to vector<24x1xf32>
      %24 = arith.addf %20, %23 : vector<24x1xf32>
      %25 = math.rsqrt %24 : vector<24x1xf32>
      %26 = vector.broadcast %25 : vector<24x1xf32> to vector<24x64xf32>
      %27 = arith.mulf %22, %26 : vector<24x64xf32>
      %c0_13 = arith.constant 0 : index
      %c0_14 = arith.constant 0 : index
      %28 = vector.load %arg5[%c0_13, %c0_14] : memref<1x64xf32, #tpu.memory_space<vmem>>, vector<1x64xf32>
      %29 = vector.broadcast %28 : vector<1x64xf32> to vector<24x64xf32>
      %30 = arith.mulf %27, %29 : vector<24x64xf32>
      %c0_15 = arith.constant 0 : index
      %c0_16 = arith.constant 0 : index
      %31 = vector.load %arg6[%c0_15, %c0_16] : memref<1x64xf32, #tpu.memory_space<vmem>>, vector<1x64xf32>
      %32 = vector.broadcast %31 : vector<1x64xf32> to vector<24x64xf32>
      %33 = arith.addf %30, %32 : vector<24x64xf32>
      %34 = arith.truncf %33 : vector<24x64xf32> to vector<24x64xbf16>
      %c0_17 = arith.constant 0 : index
      %c0_18 = arith.constant 0 : index
      %35 = vector.load %arg8[%c0_17, %c0_18] : memref<24x64xbf16, #tpu.memory_space<vmem>>, vector<24x64xbf16>
      tpu.vector_store %arg8[%c0_17, %c0_18], %34 {strides = array<i32>} : memref<24x64xbf16, #tpu.memory_space<vmem>>, vector<24x64xbf16>,
    } else {
    }
    %c0 = arith.constant 0 : index
    %c0_1 = arith.constant 0 : index
    %3 = vector.load %arg8[%c0, %c0_1] : memref<24x64xbf16, #tpu.memory_space<vmem>>, vector<24x64xbf16>
    %c0_2 = arith.constant 0 : index
    %c0_3 = arith.constant 0 : index
    %4 = vector.load %arg4[%c0_2, %c0_3] : memref<64x128xbf16, #tpu.memory_space<vmem>>, vector<64x128xbf16>
    %cst = arith.constant dense<0.000000e+00> : vector<24x128xf32>
    %5 = tpu.matmul %3, %4, %cst {dimension_numbers = #tpu.dot_dimension_numbers<[1], [0], [0], [1], [0, 0, 1, 1], [], []>} : vector<24x64xbf16>, vector<64x128xbf16>, vector<24x128xf32> -> vector<24x128xf32>
    %6 = arith.truncf %5 : vector<24x128xf32> to vector<24x128xbf16>
    %c0_4 = arith.constant 0 : index
    %c0_5 = arith.constant 0 : index
    %7 = vector.load %arg7[%c0_4, %c0_5] : memref<24x128xbf16, #tpu.memory_space<vmem>>, vector<24x128xbf16>
    tpu.vector_store %arg7[%c0_4, %c0_5], %6 {strides = array<i32>} : memref<24x128xbf16, #tpu.memory_space<vmem>>, vector<24x128xbf16>,
    return
  }
  func.func @transform_0(%arg0: i32, %arg1: i32, %arg2: i32) -> (i32, i32) {
    %c0_i32 = arith.constant 0 : i32
    return %arg0, %arg2 : i32, i32
  }
  func.func @transform_1(%arg0: i32, %arg1: i32, %arg2: i32) -> (i32, i32) {
    %c0_i32 = arith.constant 0 : i32
    return %arg2, %arg1 : i32, i32
  }
  func.func @transform_2(%arg0: i32, %arg1: i32, %arg2: i32) -> (i32, i32) {
    %c0_i32 = arith.constant 0 : i32
    %c0_i32_0 = arith.constant 0 : i32
    return %c0_i32, %arg2 : i32, i32
  }
  func.func @transform_3(%arg0: i32, %arg1: i32, %arg2: i32) -> (i32, i32) {
    %c0_i32 = arith.constant 0 : i32
    %c0_i32_0 = arith.constant 0 : i32
    return %c0_i32, %arg2 : i32, i32
  }
  func.func @transform_4(%arg0: i32, %arg1: i32, %arg2: i32) -> (i32, i32) {
    %c0_i32 = arith.constant 0 : i32
    return %arg0, %arg1 : i32, i32
  }
}

</mosaic_0001>

<bundles_post_ra>
// kernel: tpu_custom_call.1
= control target key start
LH: loop header
LB: loop body
LE: loop exit
PB: predicated region body
PF: predicated region fallthrough
CT: control target
= control target key end

     0   :  { %s1138_s0 = inlined_call_operand.hbm [shape: bf16[24,64], index: 0, kind: input, shape index: {}]   ;;  %s1139_s1 = inlined_call_operand.hbm [shape: bf16[64,256], index: 1, kind: input, shape index: {}]   ;;  %s1140_s2 = inlined_call_operand.vmem [shape: f32[1,64], index: 2, kind: input, shape index: {}]   ;;  %s1141_s3 = inlined_call_operand.vmem [shape: f32[1,64], index: 3, kind: input, shape index: {}]   ;;  %s1142_s4 = inlined_call_operand.hbm [shape: bf16[24,256], index: 4, kind: output, shape index: {}]  }
   0x1   :  { %1146 = sst [smem:[#allocation13_spill]] %s1138_s0 }
   0x2   :  { %9 = vsyncpa [#allocation4], 0 }
   0x3   :  { %10 = vsyncpa [#allocation7], 0 }
   0x4   :  { %12 = vsyncpa [#allocation7 + $0x1], 0 }
   0x5   :  { %13 = vsyncpa [#allocation5], 0 }
   0x6   :  { %15 = vsyncpa [#allocation5 + $0x1], 0  ;;  %s956_s15 = smov 0   ;;  %s958_s16 = smov 0  }
   0x7   :  { %s960_s17 = smov 0   ;;  %s962_s18 = smov 0  }
   0x8   :  { %s964_s19 = smov 0   ;;  %s966_s20 = smov 0  }
   0x9 LB: > { %s628_s21 = sadd.s32 4294967295, %s921_s20   ;;  %s629_s22 = sadd.s32 4294967294, %s921_s20   ;;  %s921_s20 = sphi %s966_s20, %s21_s20   ;;  %s917_s19 = sphi %s964_s19, %s1163_s19   ;;  %s913_s18 = sphi %s962_s18, %s1162_s18   ;;  %s909_s17 = sphi %s960_s17, %s1161_s17   ;;  %s905_s16 = sphi %s958_s16, %s1160_s16   ;;  %s901_s15 = sphi %s956_s15, %s1159_s15  }
   0xa   : > { %p90_p0 = scmp.ne.s32.totalorder %s905_s16, %s901_s15  ;;  %p990_p1 = scmp.eq.s32.totalorder %s628_s21, 0 }
   0xb   : > { %p994_p2 = scmp.eq.s32.totalorder %s628_s21, 1  ;;  %p174_p3 = scmp.eq.s32.totalorder %s629_s22, 1 }
   0xc   : > { %p1000_p4 = por %p990_p1, %p90_p0  ;;  %p630_p5 = scmp.ge.s32.totalorder %s921_s20, 1 }
   0xd   : > { %p1005_p6 = por %p174_p3, %p90_p0  ;;  %p181_p7 = scmp.lt.s32.totalorder %s921_s20, 3 }
   0xe   : > { %s1151_s0 = sld [smem:[#allocation13_spill]]  ;;  %s923_s5 = smov [#allocation3]  }
   0xf   : > { %p1013_p8 = pnand %p630_p5, %p181_p7  ;;  %s198_s6 = sshll.u32 %s923_s5, 4  ;;  %s199_s6 = int_to_ptr.vmem [resolvable:$true] %s198_s6 }
  0x10   : > { %p634_p11 = scmp.ge.s32.totalorder %s921_s20, 2  ;;  %s1143_s7 = smov 64  }
  0x11   : > { %p693_p9 = pneg %p1013_p8  ;;  %s1144_s8 = smov 4  }
  0x12   : > { %s36_s9 = sadd.s32 1, %s917_s19  ;;  %s77_s10 = sadd.s32 1, %s909_s17 }
  0x13   : > { %p694_p10 = pnand %p693_p9, %p990_p1  ;;  %p38_p12 = scmp.ge.s32.totalorder %s36_s9, 2 }
  0x14   : > { %s196_s29 = sshll.u32 %s1151_s0, 4  ;;  %p84_p13 = scmp.ne.s32.totalorder %s909_s17, %s905_s16  ;;  %s197_s29 = int_to_ptr.hbm [resolvable:$true] %s196_s29 }
  0x15   : > { %696 = dma.hbm_to_vmem [thread:$0]  (!%p694_p10), %s197_s29, 192, %s199_s6, [#allocation4], %s1143_s7, %s1143_s7, %s1144_s8  }
  0x16   : > { %p85_p0 = scmp.eq.s32.totalorder %s921_s20, 0  ;;  %s1165_s9 = smov (%p38_p12, %s36_s9), 0 }
  0x17   : > { %1153 = sst [smem:[#allocation12_spill]] %s1165_s9  ;;  %p1038_p5 = por %p994_p2, %p84_p13 }
  0x18   : > { %p1032_p3 = por %p85_p0, %p84_p13  ;;  %s73_s13 = ssub.s32 %s917_s19, %s1165_s9 }
  0x19   : > { %p706_p7 = scmp.lt.s32.totalorder %s921_s20, 2  ;;  %p75_p9 = scmp.eq.s32.totalorder %s73_s13, 0 }
  0x1a   : > { %s224_s14 = sand.u32 1, %s909_s17   ;;  %s636_s27 = sshll.u32 %s917_s19, 2 }
  0x1b   : > { %s635_s21 = sshll.u32 %s224_s14, 5  ;;  %s235_s5 = scalar_lea.hbm %s1139_s1, %s636_s27 }
  0x1c   : > { %s1047_s22 = scalar_select %p75_p9, %s909_s17, %s77_s10  }
  0x1d   : > { %s228_s6 = scalar_lea.vmem [#allocation6], %s635_s21  ;;  %s236_s24 = sshll.u32 %s235_s5, 4  ;;  %s237_s24 = int_to_ptr.hbm [resolvable:$true] %s236_s24 }
  0x1e   : > { %s238_s7 = sshll.u32 %s228_s6, 4  ;;  %p698_p2 = pnand %p706_p7, %p1032_p3  ;;  %s239_s7 = int_to_ptr.vmem [resolvable:$true] %s238_s7 }
  0x1f   : > { %s225_s8 = scalar_lea.sflag [#allocation7], %s224_s14  ;;  %s926_s0 = smov 128  }
  0x20   : > { %s1156_s9 = smov 4   ;;  %s1157_s13 = smov 64  }
  0x21   : > { %700 = dma.hbm_to_vmem [thread:$0]  (!%p698_p2), %s237_s24, 512, %s239_s7, %s225_s8, %s926_s0, %s1157_s13, %s1156_s9  }
  0x22   : > { %250 = sbr.rel (%p1013_p8) target bundleno = 498 (0x1f2), region = 36 }
  0x27   : > { %888 = dma.done.wait (%p990_p1), [#allocation4], 192  }
  0x28   : > { %890 = vsyncadd (%p990_p1), [#allocation4], 4294967104  ;;  %s1064_s10 = sand.u32 1, %s905_s16  }
  0x29   : > { %s639_s11 = sshll.u32 %s1064_s10, 5  ;;  %s258_s14 = scalar_lea.sflag [#allocation7], %s1064_s10 }
  0x2a   : > { %s1068_s21 = scalar_lea.vmem [#allocation6], %s639_s11 }
  0x2b   : > { %892 = dma.done.wait (%p1000_p4), %s258_s14, 512  }
  0x2c   : > { %894 = vsyncadd (%p1000_p4), %s258_s14, 4294966784  ;;  %s684_s0 = smul.u32 12, %s1064_s10  ;;  %p640_p1 = scmp.ne.s32.totalorder %s913_s18, 0 }
  0x2e   : > { %s1075_s30 = scalar_lea.vmem [#allocation8], %s684_s0  ;;  %306 = sbr.rel (%p640_p1) target bundleno = 341 (0x155), region = 48 }
  0x33   : > { %v672_v0 = vld [vmem:[#allocation3] sm:$0xff]   ;;  %vm313_vm0 = vcmask 523264   ;;  %v309_v1 = vld [vmem:[#allocation3 + $0x8] sm:$0xf]  ;;  %v927_v8 = vmov 64.0   ;;  %vm404_vm6 = vcmask 519168  }
  0x34   : > { %v673_v2 = vunpack.c.l.bf16 %v672_v0  ;;  %v312_v3 = vunpack.c.l.bf16 %v309_v1  ;;  %v674_v6 = vunpack.c.h.bf16 %v672_v0  ;;  %767 = vrcp.f32 %v927_v8  ;;  %v765_v47 = vld [vmem:[%s1140_s2] ss:$0 sm:$0xff] }
  0x35   : > { %v766_v50 = vld [vmem:[%s1141_s3] ss:$0 sm:$0xff] }
  0x36   : > { %v314_v4 = vsel %vm313_vm0, %v673_v2, 0.0  ;;  %v320_v5 = vsel %vm313_vm0, %v312_v3, 0.0  ;;  %v317_v7 = vsel %vm313_vm0, %v674_v6, 0.0 }
  0x37   : > { %315 = vadd.xlane.f32.xlu0 %v314_v4  ;;  %321 = vadd.xlane.f32.xlu1 %v320_v5 }
  0x3a   : > { %v768_v9 = vpop.eup %767 }
  0x3b   : > { %v324_v10 = vmul.f32 64.0, %v768_v9  ;;  %vm328_vm1 = vweird.f32 %v768_v9 }
  0x3d   : > { %v325_v11 = vsub.f32 1.0, %v324_v10 }
  0x3f   : > { %318 = vadd.xlane.f32.xlu0 %v317_v7  ;;  %v326_v12 = vmul.f32 %v768_v9, %v325_v11 }
  0x41   : > { %v327_v13 = vadd.f32 %v768_v9, %v326_v12 }
  0x43   : > { %v329_v14 = vsel %vm328_vm1, %v768_v9, %v327_v13 }
  0xaa   : > { %v316_v15 = vpop.xlane.xlu0 %315  ;;  %v322_v19 = vpop.xlane.xlu1 %321 }
  0xab   : > { %v330_v16 = vmul.f32 %v329_v14, %v316_v15  ;;  %v332_v23 = vmul.f32 %v329_v14, %v322_v19 }
  0xad   : > { %v333_v17 = vsub.f32 %v673_v2, %v330_v16  ;;  %v335_v25 = vsub.f32 %v312_v3, %v332_v23 }
  0xaf   : > { %v336_v18 = vmul.f32 %v333_v17, %v333_v17  ;;  %v338_v28 = vmul.f32 %v335_v25, %v335_v25 }
  0xb1   : > { %v339_v20 = vsel %vm313_vm0, %v336_v18, 0.0  ;;  %v345_v29 = vsel %vm313_vm0, %v338_v28, 0.0 }
  0xb2   : > { %340 = vadd.xlane.f32.xlu1 %v339_v20  ;;  %v319_v21 = vpop.xlane.xlu0 %318 }
  0xb3   : > { %v331_v22 = vmul.f32 %v329_v14, %v319_v21 }
  0xb5   : > { %v334_v24 = vsub.f32 %v674_v6, %v331_v22 }
  0xb7   : > { %v337_v26 = vmul.f32 %v334_v24, %v334_v24 }
  0xb9   : > { %v342_v27 = vsel %vm313_vm0, %v337_v26, 0.0 }
  0xba   : > { %343 = vadd.xlane.f32.xlu2 %v342_v27 }
  0xc2   : > { %346 = vadd.xlane.f32.xlu2 %v345_v29 }
 0x125   : > { %v341_v30 = vpop.xlane.xlu1 %340 }
 0x126   : > { %v348_v31 = vmul.f32 %v341_v30, %v329_v14 }
 0x128   : > { %v351_v32 = vadd.f32 1e-05, %v348_v31 }
 0x12a   : > { %769 = vrsqrt.f32 %v351_v32  ;;  %vm360_vm3 = vweird.f32 %v351_v32 }
 0x12d   : > { %v344_v33 = vpop.xlane.xlu2 %343 }
 0x12e   : > { %v349_v34 = vmul.f32 %v344_v33, %v329_v14 }
 0x130   : > { %v770_v35 = vpop.eup %769  ;;  %v352_v36 = vadd.f32 1e-05, %v349_v34 }
 0x131   : > { %v355_v37 = vmul.f32 %v770_v35, %v351_v32  ;;  %vm361_vm2 = vweird.f32 %v770_v35 }
 0x132   : > { %771 = vrsqrt.f32 %v352_v36  ;;  %vm362_vm4 = vmor %vm360_vm3, %vm361_vm2  ;;  %vm370_vm7 = vweird.f32 %v352_v36 }
 0x133   : > { %v356_v38 = vmul.f32 %v770_v35, %v355_v37 }
 0x135   : > { %v357_v39 = vmul.f32 0.5, %v356_v38  ;;  %v347_v40 = vpop.xlane.xlu2 %346 }
 0x136   : > { %v350_v41 = vmul.f32 %v347_v40, %v329_v14 }
 0x137   : > { %v358_v42 = vsub.f32 1.5, %v357_v39 }
 0x138   : > { %v772_v43 = vpop.eup %771  ;;  %v353_v44 = vadd.f32 1e-05, %v350_v41 }
 0x139   : > { %v359_v45 = vmul.f32 %v770_v35, %v358_v42  ;;  %v365_v46 = vmul.f32 %v772_v43, %v352_v36  ;;  %vm371_vm5 = vweird.f32 %v772_v43 }
 0x13a   : > { %773 = vrsqrt.f32 %v353_v44  ;;  %vm372_vm8 = vmor %vm370_vm7, %vm371_vm5  ;;  %vm380_vm10 = vweird.f32 %v353_v44 }
 0x13b   : > { %v363_v48 = vsel %vm362_vm4, %v770_v35, %v359_v45  ;;  %v366_v49 = vmul.f32 %v772_v43, %v365_v46 }
 0x13c   : > { %v384_v51 = vmul.f32 %v363_v48, %v333_v17 }
 0x13d   : > { %v367_v52 = vmul.f32 0.5, %v366_v49 }
 0x13e   : > { %v391_v53 = vmul.f32 %v765_v47, %v384_v51 }
 0x13f   : > { %v368_v54 = vsub.f32 1.5, %v367_v52 }
 0x140   : > { %v774_v55 = vpop.eup %773  ;;  %v398_v56 = vadd.f32 %v766_v50, %v391_v53 }
 0x141   : > { %v369_v57 = vmul.f32 %v772_v43, %v368_v54  ;;  %v375_v58 = vmul.f32 %v774_v55, %v353_v44  ;;  %vm381_vm9 = vweird.f32 %v774_v55 }
 0x142   : > { %v401_v59 = vpack.c.bf16 %v398_v56, %v398_v56  ;;  %vm382_vm11 = vmor %vm380_vm10, %vm381_vm9 }
 0x143   : > { %v373_v60 = vsel %vm372_vm8, %v772_v43, %v369_v57  ;;  %v376_v61 = vmul.f32 %v774_v55, %v375_v58 }
 0x144   : > { %405 = vst.msk [vmem:[#allocation2] sm:$0xf] %vm404_vm6, %v401_v59  ;;  %v385_v62 = vmul.f32 %v373_v60, %v334_v24 }
 0x145   : > { %v377_v63 = vmul.f32 0.5, %v376_v61 }
 0x146   : > { %v392_v0 = vmul.f32 %v765_v47, %v385_v62 }
 0x147   : > { %v378_v1 = vsub.f32 1.5, %v377_v63 }
 0x148   : > { %v399_v2 = vadd.f32 %v766_v50, %v392_v0 }
 0x149   : > { %v379_v3 = vmul.f32 %v774_v55, %v378_v1 }
 0x14a   : > { %v402_v4 = vpack.c.bf16 %v399_v2, %v399_v2 }
 0x14b   : > { %v383_v5 = vsel %vm382_vm11, %v774_v55, %v379_v3 }
 0x14c   : > { %406 = vst.msk [vmem:[#allocation2 + $0x4] sm:$0xf] %vm404_vm6, %v402_v4  ;;  %v386_v6 = vmul.f32 %v383_v5, %v335_v25 }
 0x14e   : > { %v393_v7 = vmul.f32 %v765_v47, %v386_v6 }
 0x150   : > { %v400_v8 = vadd.f32 %v766_v50, %v393_v7 }
 0x152   : > { %v403_v9 = vpack.c.bf16 %v400_v8, %v400_v8 }
 0x154   : > { %407 = vst.msk [vmem:[#allocation2 + $0x8] sm:$0xf] %vm404_vm6, %v403_v9 }
 0x155 PF: > { %v670_v10 = vld [vmem:[%s1068_s21 + $0x18] sm:$0xff]  ;;  %v669_v11 = vld [vmem:[%s1068_s21 + $0x10] sm:$0xff]  ;;  %v668_v12 = vld [vmem:[%s1068_s21 + $0x8] sm:$0xff]  ;;  %vm451_vm12 = vcmask 523264   ;;  %s663_s9 = sshll.u32 %s913_s18, 2  ;;  %s497_s5 = sshll.u32 %s1075_s30, 4  ;;  %s498_s5 = int_to_ptr.vmem [resolvable:$true] %s497_s5 }
 0x156   : > { %462 = vmatpush.bf16.msra.mxu0 %v670_v10  ;;  %680 = vmatpush.bf16.msra.mxu1 %v670_v10  ;;  %v667_v15 = vld [vmem:[%s1068_s21] sm:$0xff]  ;;  %v666_v16 = vld [vmem:[#allocation2] sm:$0xff]  ;;  %s496_s29 = scalar_lea.hbm %s1142_s4, %s663_s9  ;;  %s483_s24 = scalar_lea.sflag [#allocation5], %s1064_s10 }
 0x157   : > { %s499_s6 = sshll.u32 %s496_s29, 4  ;;  %s855_s21 = scalar_lea.hbm %s1142_s4, 24  ;;  %s500_s6 = int_to_ptr.hbm [resolvable:$true] %s499_s6 }
 0x158   : > { %s849_s13 = sshra.s32 %s500_s6, 4  ;;  %s850_s13 = int_to_ptr.hbm [resolvable:$true] %s849_s13 }
 0x159   : > { %s851_s18 = scalar_lea.hbm %s850_s13, 12  ;;  %p856_p12 = scmp.lt.s32.totalorder %s850_s13, %s1142_s4 }
 0x15a   : > { %463 = vmatpush.bf16.msra.mxu0 %v669_v11  ;;  %681 = vmatpush.bf16.msra.mxu1 %v669_v11  ;;  %p852_p4 = scmp.ne.s32.totalorder %s850_s13, %s851_s18  ;;  %p857_p13 = scmp.lt.s32.totalorder %s855_s21, %s851_s18 }
 0x15b   : > { %v410_v13 = vld [vmem:[#allocation2 + $0x8] sm:$0xf] }
 0x15c   : > { %v424_v14 = vunpack.c.l.b16 %v410_v13  ;;  %p853_p8 = pnand %p852_p4, %p1038_p5  ;;  %p858_p0 = por %p857_p13, %p856_p12 }
 0x15e   : > { %464 = vmatpush.bf16.msra.mxu0 %v668_v12  ;;  %682 = vmatpush.bf16.msra.mxu1 %v668_v12  ;;  %v426_v17 = vpack.c.b16 %v424_v14, %v424_v14  ;;  %p854_p10 = pneg %p853_p8 }
 0x160   : > { %p859_p3 = pnand %p858_p0, %p854_p10 }
 0x162   : > { %465 = vmatpush.bf16.msra.mxu0 %v667_v15  ;;  %683 = vmatpush.bf16.msra.mxu1 %v667_v15 }
 0x165   : > { %661 = vmatmul.msk.bf16.vlgmr.msra.gmra.mxu0 %vm451_vm12, %v666_v16  ;;  %662 = vmatmul.msk.bf16.vlgmr.msra.gmra.mxu1 %vm451_vm12, %v426_v17 }
 0x1e2   : > { %v467_v18 = vpop.f32.mrf.mxu0  ;;  %v472_v19 = vpop.f32.mrf.mxu1 }
 0x1e3   : > { %v478_v20 = vpack.c.bf16 %v472_v19, %v472_v19 }
 0x1e5   : > { %481 = vst [vmem:[%s1075_s30 + $0x8] sm:$0xf] %v478_v20 }
 0x1ea   : > { %v469_v21 = vpop.f32.mrf.mxu0  ;;  %v474_v22 = vpop.f32.mrf.mxu1 }
 0x1eb   : > { %v678_v23 = vpack.c.bf16 %v469_v21, %v467_v18 }
 0x1ed   : > { %679 = vst [vmem:[%s1075_s30] sm:$0xff] %v678_v23  }
 0x1ee   : > { %862 = shalt.err (!%p859_p3)
}
 0x1ef   : > { %s928_s10 = smov 64   ;;  %s929_s30 = smov 128  }
 0x1f0   : > { %s930_s25 = smov 4  }
 0x1f1   : > { %691 = dma.vmem_to_hbm [thread:$0]  (%p1038_p5), %s498_s5, 192, %s500_s6, %s483_s24, %s928_s10, %s929_s30, %s930_s25  }
 0x1f2 PF: > { %s514_s7 = sand.u32 1, %s901_s15   ;;  %p702_p7 = pnand %p634_p11, %p1005_p6 }
 0x1f3   : > { %s515_s8 = scalar_lea.sflag [#allocation5], %s514_s7 }
 0x1f4   : > { %p703_p9 = pneg %p702_p7 }
 0x1f6   : > { %896 = dma.done.wait (%p703_p9), %s515_s8, 192  }
 0x1f7   : > { %898 = vsyncadd (%p703_p9), %s515_s8, 4294967104  ;;  %s21_s20 = sadd.s32 1, %s921_s20   ;;  %s1158_s12 = sld [smem:[#allocation12_spill]] }
 0x1f8   : > { %p18_p2 = scmp.ge.s32.totalorder %s21_s20, 4   ;;  %s1159_s15 = smov %s905_s16 }
 0x1f9   : > { %s1160_s16 = smov %s909_s17  ;;  %s1161_s17 = smov %s1047_s22 }
 0x1fa   : > { %s1162_s18 = smov %s917_s19  ;;  %20 = sbr.rel (!%p18_p2) target bundleno = 9 (0x9), region = 97 }
 0x1fd   : > { %s1163_s19 = smov %s1158_s12 }
 0x1ff   :  { %521 = vsyncpa [#allocation4], 1 }
 0x200   :  { %523 = vsyncpa [#allocation4 + $0x1], 1 }
 0x201   :  { %524 = vsyncpa [#allocation7], 1 }
 0x202   :  { %526 = vsyncpa [#allocation7 + $0x1], 1 }
 0x203   :  { %527 = vsyncpa [#allocation5], 1 }
 0x204   :  { %529 = vsyncpa [#allocation5 + $0x1], 1 }

</bundles_post_ra>
